<compile_context>
chip_gen: v7x
topology: tpu7x:2x2x1
jax: 0.10.0
libtpu: 0.0.40
codegen_flags: <defaults>
</compile_context>

<pallas_src>
import functools
import math

import jax
import jax.numpy as jnp
from jax.experimental import pallas as pl
from jax.experimental.pallas import tpu as pltpu


def _reciprocal_kernel(x_ref, o_ref, *, b):
    x = x_ref[...]
    if x.dtype != jnp.float32:
        # Compute in f32 (safe on all generations, incl. v5e's non-bf16 EUP);
        # cast back on store.  Free under the DMA for this mem-bound kernel.
        x = x.astype(jnp.float32)
    if b != 0.0:
        x = x + b
    o_ref[...] = pl.reciprocal(x, approx=False).astype(o_ref.dtype)


def _device_kind():
    try:
        devs = jax.devices()
        if devs and devs[0].platform == "tpu":
            return devs[0].device_kind.lower()
    except Exception:
        pass
    return ""


def _pick_columns(n, max_c=4096):
    """Pick a lane-friendly column count C for a 2D (n // C, C) view."""
    if n < 128:
        return None
    hi = min(max_c, n)
    # 1) Fully lane-dense: C a multiple of 128 dividing n.  Prefer the largest
    #    such C that still leaves >= 8 rows (sublane density).
    mult128 = [c for c in range(128, hi + 1, 128) if n % c == 0]
    if mult128:
        good = [c for c in mult128 if n // c >= 8]
        return max(good) if good else max(mult128)
    # 2) Any divisor in [128, max_c]: maximize lane utilization (then rows>=8,
    #    then size).  Still much better than a 16-wide lane axis.
    best_key, best_c = None, None
    for c in range(hi, 127, -1):
        if n % c == 0:
            util = c / (128.0 * ((c + 127) // 128))
            key = (n // c >= 8, util, c)
            if best_key is None or key > best_key:
                best_key, best_c = key, c
    return best_c  # may be None (e.g. prime n)


def reciprocal(x, b=0.0, *, min_pallas_bytes=1 << 20, max_lane_cols=4096):
    """Compute 1.0 / (x + b) with a tiled, lane-dense Pallas TPU kernel."""
    # TODO(synk): b is baked as a static compile-time constant (it is a module
    # attribute in the PyTorch spec); a traced JAX scalar b is not supported.
    b = float(b)
    orig_shape = x.shape

    # PyTorch promotes integer/bool inputs to float for `1.0 / x`.
    if not jnp.issubdtype(x.dtype, jnp.floating):
        x = x.astype(jnp.float32)
    dtype = x.dtype
    itemsize = jnp.dtype(dtype).itemsize
    n = x.size

    def _xla_fallback():
        return (1.0 / (x + b)).astype(dtype).reshape(orig_shape)

    # Small-input bypass: a Pallas launch is pure fixed overhead here; XLA
    # fuses this elementwise op for free.
    if n == 0 or n * itemsize < min_pallas_bytes:
        return _xla_fallback()

    C = _pick_columns(n, max_lane_cols)
    if C is None:
        # Pathological size (no divisor >= 128): let XLA handle it.
        return _xla_fallback()
    R = n // C
    x2 = x.reshape(R, C)

    kind = _device_kind()
    is_v5 = "v5" in kind
    is_multicore = "7" in kind  # v7x: 2 TensorCores share the grid's parallel axes.
    # Constant-byte tiles: ~2 MiB/buffer on v5e (16 MiB default scoped-VMEM
    # limit), ~4 MiB/buffer on v6e/v7x (fits 2-deep in+out buffering in the
    # 32 MiB default limit).  Unknown platform -> conservative 2 MiB.
    tile_bytes = (4 << 20) if (kind and not is_v5) else (2 << 20)

    # Sublane packing: f32 -> 8 rows per vreg, bf16 -> 16, int8/fp8 -> 32.
    row_pack = max(8, 32 // itemsize)

    bc = C  # full lane extent (C <= max_lane_cols), always legal.
    br = max(row_pack, (tile_bytes // (bc * itemsize)) // row_pack * row_pack)
    if br >= R:
        br = R  # full extent: always a legal block dim.
    # v7x: ensure the "parallel" grid has >= 2 steps so both TCs get work.
    if (is_multicore and R >= 2 * row_pack
            and pl.cdiv(R, br) * pl.cdiv(C, bc) < 2):
        br = math.ceil(math.ceil(R / 2) / row_pack) * row_pack

    grid = (pl.cdiv(R, br), pl.cdiv(C, bc))

    cost = pl.CostEstimate(
        flops=0 if b == 0.0 else n,
        transcendentals=n,
        bytes_accessed=2 * n * itemsize,  # read x once, write y once
    )

    out = pl.pallas_call(
        functools.partial(_reciprocal_kernel, b=b),
        out_shape=jax.ShapeDtypeStruct((R, C), dtype),
        grid_spec=pltpu.PrefetchScalarGridSpec(
            num_scalar_prefetch=0,
            grid=grid,
            in_specs=[pl.BlockSpec((br, bc), lambda i, j: (i, j))],
            out_specs=pl.BlockSpec((br, bc), lambda i, j: (i, j)),
        ),
        compiler_params=pltpu.CompilerParams(
            dimension_semantics=("parallel", "parallel")
        ),
        cost_estimate=cost,
    )(x2)

    return out.reshape(orig_shape)


if __name__ == "__main__":
    root = jax.random.PRNGKey(0)
    k1, k2, k3 = jax.random.split(root, 3)
    b = 0.0  # module default

    def _shift_from_zero(v):
        return v + jnp.where(v >= 0, 1.0, -1.0)

    # 1) Module-consistent small NCHW input.
    x_small = _shift_from_zero(jax.random.normal(k1, (2, 4, 16, 16), jnp.float32))
    ref_small = 1.0 / (x_small + b)
    # Default path: tiny input -> fused XLA bypass.
    y_bypass = jax.block_until_ready(reciprocal(x_small, b))
    # Force the Pallas kernel on the same small shape to exercise it.
    y_small = jax.block_until_ready(reciprocal(x_small, b, min_pallas_bytes=0))
    assert y_small.shape == x_small.shape and y_small.dtype == x_small.dtype
    assert jnp.allclose(y_bypass, ref_small, rtol=1e-6, atol=1e-6)
    assert jnp.allclose(y_small, ref_small, rtol=1e-6, atol=1e-6)

    # 2) Streaming-sized input that takes the tiled Pallas path by default.
    x_big = _shift_from_zero(jax.random.normal(k2, (2, 4, 256, 256), jnp.float32))
    y_big = jax.block_until_ready(reciprocal(x_big, b))
    assert jnp.allclose(y_big, 1.0 / (x_big + b), rtol=1e-6, atol=1e-6)

    # 3) Awkward (non-128-divisible) size exercising the divisor fallback.
    x_odd = _shift_from_zero(jax.random.normal(k3, (5, 7, 9, 11), jnp.float32))
    y_odd = jax.block_until_ready(reciprocal(x_odd, b, min_pallas_bytes=0))
    assert jnp.allclose(y_odd, 1.0 / (x_odd + b), rtol=1e-6, atol=1e-6)

    # 4) bf16 path (constant-byte tiles, compute in f32, store bf16).
    x_bf16 = _shift_from_zero(
        jax.random.normal(k2, (2, 4, 256, 256), jnp.float32)).astype(jnp.bfloat16)
    y_bf16 = jax.block_until_ready(reciprocal(x_bf16, b))
    ref_bf16 = (1.0 / (x_bf16.astype(jnp.float32) + b)).astype(jnp.bfloat16)
    assert y_bf16.dtype == jnp.bfloat16
    assert jnp.allclose(y_bf16.astype(jnp.float32), ref_bf16.astype(jnp.float32),
                        rtol=2e-2, atol=2e-2)

    print("KERNEL_OK")
</pallas_src>

<mosaic_0001>
module attributes {stable_mosaic.version = 11 : i64} {
  func.func @_reciprocal_kernel(%arg0: i32, %arg1: i32, %arg2: memref<8x256xf32, #tpu.memory_space<vmem>>, %arg3: memref<8x256xf32, #tpu.memory_space<vmem>>) attributes {dimension_semantics = [#tpu.dimension_semantics<parallel>, #tpu.dimension_semantics<parallel>], iteration_bounds = array<i64: 1, 1>, scalar_prefetch = 0 : i64, scratch_operands = 0 : i64, tpu.core_type = #tpu.core_type<tc>, window_params = [{transform_indices = @transform_0, window_bounds = array<i64: 8, 256>}, {transform_indices = @transform_1, window_bounds = array<i64: 8, 256>}]} {
    %c0 = arith.constant 0 : index
    %c0_0 = arith.constant 0 : index
    %0 = vector.load %arg2[%c0, %c0_0] : memref<8x256xf32, #tpu.memory_space<vmem>>, vector<8x256xf32>
    %1 = tpu.reciprocal %0 : vector<8x256xf32> -> vector<8x256xf32>
    %c0_1 = arith.constant 0 : index
    %c0_2 = arith.constant 0 : index
    %2 = vector.load %arg3[%c0_1, %c0_2] : memref<8x256xf32, #tpu.memory_space<vmem>>, vector<8x256xf32>
    tpu.vector_store %arg3[%c0_1, %c0_2], %1 {strides = array<i32>} : memref<8x256xf32, #tpu.memory_space<vmem>>, vector<8x256xf32>,
    return
  }
  func.func @transform_0(%arg0: i32, %arg1: i32) -> (i32, i32) {
    %c0_i32 = arith.constant 0 : i32
    return %arg0, %arg1 : i32, i32
  }
  func.func @transform_1(%arg0: i32, %arg1: i32) -> (i32, i32) {
    %c0_i32 = arith.constant 0 : i32
    return %arg0, %arg1 : i32, i32
  }
}

</mosaic_0001>

<bundles_post_ra>
// kernel: tpu_custom_call.1
= control target key start
LH: loop header
LB: loop body
LE: loop exit
PB: predicated region body
PF: predicated region fallthrough
CT: control target
= control target key end

     0   :  { %6 = vsyncpa [#allocation3], 0  ;;  %s132_s0 = inlined_call_operand.hbm [shape: f32[8,256], index: 0, kind: input, shape index: {}]   ;;  %s133_s1 = inlined_call_operand.hbm [shape: f32[8,256], index: 1, kind: output, shape index: {}]  }
   0x1   :  { %7 = vsyncpa [#allocation4], 0  ;;  %s96_s6 = smov [#allocation2]   ;;  %s48_s10 = scalar_lea.hbm %s132_s0, 256 }
   0x2   :  { %s14_s7 = sshll.u32 %s96_s6, 4  ;;  %p49_p0 = scmp.ne.s32.totalorder %s132_s0, %s48_s10  ;;  %s15_s7 = int_to_ptr.vmem [resolvable:$true] %s14_s7 }
   0x3   :  { %p52_p1 = scmp.lt.u32.totalorder %s48_s10, %s132_s0 }
   0x5   :  { %p54_p2 = pnand %p52_p1, %p49_p0 }
   0x7   :  { %57 = shalt.err (!%p54_p2)
}
   0x8   :  { %s58_s15 = scalar_lea.vmem %s15_s7, 256  ;;  %p63_p4 = scmp.lt.s32.totalorder %s15_s7, %s15_s7 }
   0x9   :  { %p59_p3 = scmp.ne.s32.totalorder %s15_s7, %s58_s15  ;;  %p64_p5 = scmp.lt.s32.totalorder %s58_s15, %s58_s15 }
   0xb   :  { %p65_p6 = por %p64_p5, %p63_p4 }
   0xd   :  { %p66_p7 = pnand %p65_p6, %p59_p3 }
   0xf   :  { %69 = shalt.err (!%p66_p7)
}
  0x10   :  { %17 = dma.hbm_to_vmem [thread:$0]  %s132_s0, 256, %s15_s7, [#allocation3]  }
  0x11   :  { %92 = dma.done.wait [#allocation3], 256  }
  0x12   :  { %93 = vsyncadd [#allocation3], 4294967040  ;;  %v21_v0 = vld [vmem:[#allocation2] sm:$0xff]  ;;  %v22_v1 = vld [vmem:[#allocation2 + $0x8] sm:$0xff]  ;;  %s97_s18 = smov [#allocation5]  }
  0x13   :  { %44 = vrcp.f32 %v21_v0  ;;  %s33_s19 = sshll.u32 %s97_s18, 4  ;;  %s34_s19 = int_to_ptr.vmem [resolvable:$true] %s33_s19 }
  0x14   :  { %46 = vrcp.f32 %v22_v1  ;;  %s70_s20 = scalar_lea.vmem %s34_s19, 256  ;;  %p75_p9 = scmp.lt.s32.totalorder %s34_s19, %s34_s19 }
  0x15   :  { %p71_p8 = scmp.ne.s32.totalorder %s34_s19, %s70_s20  ;;  %p76_p10 = scmp.lt.s32.totalorder %s70_s20, %s70_s20 }
  0x17   :  { %p77_p11 = por %p76_p10, %p75_p9 }
  0x19   :  { %p78_p12 = pnand %p77_p11, %p71_p8 }
  0x1d   :  { %v45_v2 = vpop.eup %44 }
  0x1e   :  { %v47_v3 = vpop.eup %46  ;;  %25 = vst [vmem:[#allocation5] sm:$0xff] %v45_v2 }
  0x1f   :  { %26 = vst [vmem:[#allocation5 + $0x8] sm:$0xff] %v47_v3 }
  0x20   :  { %81 = shalt.err (!%p78_p12)
}
  0x21   :  { %s82_s22 = scalar_lea.hbm %s133_s1, 256 }
  0x22   :  { %p83_p13 = scmp.ne.s32.totalorder %s133_s1, %s82_s22  ;;  %p86_p0 = scmp.lt.u32.totalorder %s82_s22, %s133_s1 }
  0x24   :  { %p88_p1 = pnand %p86_p0, %p83_p13 }
  0x26   :  { %91 = shalt.err (!%p88_p1)
}
  0x27   :  { %36 = dma.vmem_to_hbm [thread:$0]  %s34_s19, 256, %s133_s1, [#allocation4]  }
  0x28   :  { %94 = dma.done.wait [#allocation4], 256  }
  0x29   :  { %95 = vsyncadd [#allocation4], 4294967040 }
  0x2a   :  { %40 = vsyncpa [#allocation3], 1 }
  0x2b   :  { %41 = vsyncpa [#allocation4], 1 }

</bundles_post_ra>
